<compile_context>
chip_gen: v5e
topology: v5e:2x2
jax: 0.10.0
libtpu: 0.0.40
codegen_flags: <defaults>
</compile_context>

<pallas_src>
import functools

import jax
import jax.numpy as jnp
from jax.experimental import pallas as pl
from jax.experimental.pallas import tpu as pltpu


def _round_up(x, m):
    return (x + m - 1) // m * m


def _vmem_capacity_bytes():
    """Physical VMEM per TensorCore; conservative 64 MiB fallback (valid on all gens)."""
    try:
        cap = getattr(pltpu.get_tpu_info(), "vmem_capacity_bytes", None)
        if cap:
            return int(cap)
    except Exception:
        pass
    return 64 << 20


def _choose_row_tiling(M, tm_max):
    """Pick (tm, m_pad).  Prefer: no padding of x, >= 2 row tiles (so the
    'parallel' row axis can shard across v7x's two TensorCores), and the largest
    tile <= tm_max (fewer grid steps / less weight re-stream on the slab path)."""
    best = 0
    d = 8
    limit = min(tm_max, M // 2)
    while d <= limit:
        if M % d == 0:
            best = d
        d += 8
    if best:
        return best, M                      # exact multiple-of-8 divisor: no pad
    if M <= tm_max:
        return M, M                         # single full-dim tile: no pad needed
    # TODO(synk): rare fallback (large M with no multiple-of-8 divisor) still pads;
    # a masked last-tile store would avoid the extra HBM pass over x.
    tm = min(tm_max, _round_up(M, 8))
    return tm, _round_up(M, tm)


def _ffn_kernel_resident(x_ref, w1_ref, b1_ref, w2_ref, b2_ref, o_ref):
    # W1/W2/b1/b2 have constant index_maps -> DMA'd once, VMEM-resident across
    # all row tiles.  Single fused pass per row tile.
    h = jnp.dot(x_ref[...].astype(w1_ref.dtype), w1_ref[...],
                preferred_element_type=jnp.float32)
    h = jnp.maximum(h + b1_ref[...].astype(jnp.float32), 0.0)
    y = jnp.dot(h.astype(w2_ref.dtype), w2_ref[...],
                preferred_element_type=jnp.float32)
    o_ref[...] = (y + b2_ref[...].astype(jnp.float32)).astype(o_ref.dtype)


def _ffn_kernel_slabbed(x_ref, w1_ref, b1_ref, w2_ref, b2_ref, o_ref, acc_ref):
    # Hidden dim tiled on the trailing "arbitrary" reduction axis; f32 VMEM
    # accumulator resident across it.
    k = pl.program_id(1)

    @pl.when(k == 0)
    def _init():
        acc_ref[...] = jnp.zeros_like(acc_ref)

    h = jnp.dot(x_ref[...].astype(w1_ref.dtype), w1_ref[...],
                preferred_element_type=jnp.float32)
    h = jnp.maximum(h + b1_ref[...].astype(jnp.float32), 0.0)
    acc_ref[...] += jnp.dot(h.astype(w2_ref.dtype), w2_ref[...],
                            preferred_element_type=jnp.float32)

    @pl.when(k == pl.num_programs(1) - 1)
    def _finalize():
        o_ref[...] = (acc_ref[...] + b2_ref[...].astype(jnp.float32)
                      ).astype(o_ref.dtype)


@functools.partial(jax.jit, static_argnames=("tm_max", "force_slabbed"))
def feed_forward(x, w1, b1, w2, b2, *, tm_max=512, force_slabbed=False):
    """x: (batch, seq, E). w1: (E, H), b1: (H,), w2: (H, E), b2: (E,)."""
    batch, seq, E = x.shape
    H = w1.shape[1]
    M = batch * seq

    xi = x.dtype.itemsize
    wi = w1.dtype.itemsize
    x2d = x.reshape(M, E)

    # ---- lane-dense padding of feature dims (no-op for widths that are already
    # multiples of 128; only toy configs like E=32 are padded). ----
    E_p = _round_up(E, 128)
    H_p = _round_up(H, 128)
    if E_p != E or H_p != H:
        w1 = jnp.pad(w1, ((0, E_p - E), (0, H_p - H)))
        b1 = jnp.pad(b1, ((0, H_p - H),))
        w2 = jnp.pad(w2, ((0, H_p - H), (0, E_p - E)))
        b2 = jnp.pad(b2, ((0, E_p - E),))
    if E_p != E:
        x2d = jnp.pad(x2d, ((0, 0), (0, E_p - E)))
    b1_2d = b1.reshape(1, H_p)
    b2_2d = b2.reshape(1, E_p)

    # ---- row tiling ----
    tm, m_pad = _choose_row_tiling(M, tm_max)
    if m_pad != M:
        x2d = jnp.pad(x2d, ((0, m_pad - M), (0, 0)))
    n_row_tiles = m_pad // tm

    # ---- VMEM budget (per physical generation; v7x has only 64 MiB/TC) ----
    vmem_cap = _vmem_capacity_bytes()
    budget = int(0.80 * vmem_cap)

    weight_bytes = (E_p * H_p + H_p * E_p + H_p + E_p) * wi
    io_bytes = 2 * (tm * E_p * xi + tm * E_p * xi)      # double-buffered x/out tiles
    h_bytes = tm * H_p * 4 + tm * H_p * wi              # f32 intermediate + cast copy

    # Resident if the (default double-buffered) weight footprint + tiles fit.
    resident_usage = 2 * weight_bytes + io_bytes + h_bytes
    use_resident = (not force_slabbed) and (resident_usage + (2 << 20) <= budget)

    flops = 4 * m_pad * E_p * H_p   # two matmuls, 2*M*E*H each

    if use_resident:
        grid = (n_row_tiles,)
        in_specs = [
            pl.BlockSpec((tm, E_p), lambda i: (i, 0)),    # x rows (pipelined)
            pl.BlockSpec((E_p, H_p), lambda i: (0, 0)),   # W1: whole, resident
            pl.BlockSpec((1, H_p), lambda i: (0, 0)),     # b1: resident
            pl.BlockSpec((H_p, E_p), lambda i: (0, 0)),   # W2: whole, resident
            pl.BlockSpec((1, E_p), lambda i: (0, 0)),     # b2: resident
        ]
        out_specs = pl.BlockSpec((tm, E_p), lambda i: (i, 0))
        scratch_shapes = ()
        kernel = _ffn_kernel_resident
        dim_sem = ("parallel",)
        vmem_need = resident_usage
        weight_traffic = weight_bytes                     # fetched exactly once
    else:
        # hidden slab: largest of {512, 256, 128} dividing H_p (H_p is a multiple
        # of 128, so 128 always works).
        th = H_p
        for cand in (512, 256, 128):
            if cand <= H_p and H_p % cand == 0:
                th = cand
                break
        grid = (n_row_tiles, H_p // th)
        in_specs = [
            pl.BlockSpec((tm, E_p), lambda i, k: (i, 0)),  # x rows
            pl.BlockSpec((E_p, th), lambda i, k: (0, k)),  # W1 slab
            pl.BlockSpec((1, th), lambda i, k: (0, k)),    # b1 slab
            pl.BlockSpec((th, E_p), lambda i, k: (k, 0)),  # W2 slab
            pl.BlockSpec((1, E_p), lambda i, k: (0, 0)),   # b2
        ]
        out_specs = pl.BlockSpec((tm, E_p), lambda i, k: (i, 0))
        scratch_shapes = (pltpu.VMEM((tm, E_p), jnp.float32),)
        kernel = _ffn_kernel_slabbed
        dim_sem = ("parallel", "arbitrary")
        slab_bytes = (E_p * th + th * E_p + th + E_p) * wi
        vmem_need = (2 * slab_bytes + io_bytes
                     + tm * th * 4 + tm * th * wi         # h + cast copy
                     + tm * E_p * 4)                      # f32 accumulator
        weight_traffic = n_row_tiles * weight_bytes       # re-streamed per row tile

    # Never exceed ~87% of physical per-core VMEM (v7x: 64 MiB), never below the
    # scoped default.
    vmem_limit = min(max(vmem_need + (4 << 20), 32 << 20), int(0.875 * vmem_cap))

    cost = pl.CostEstimate(
        flops=int(flops),
        transcendentals=0,
        bytes_accessed=int(m_pad * E_p * xi        # x read
                           + weight_traffic        # W1/W2/b1/b2 actual traffic
                           + m_pad * E_p * xi))    # out write

    out2d = pl.pallas_call(
        kernel,
        out_shape=jax.ShapeDtypeStruct((m_pad, E_p), x.dtype),
        grid_spec=pltpu.PrefetchScalarGridSpec(
            num_scalar_prefetch=0,
            grid=grid,
            in_specs=in_specs,
            out_specs=out_specs,
            scratch_shapes=scratch_shapes,
        ),
        compiler_params=pltpu.CompilerParams(
            dimension_semantics=dim_sem,
            vmem_limit_bytes=int(vmem_limit)),
        cost_estimate=cost,
    )(x2d, w1, b1_2d, w2, b2_2d)

    return out2d[:M, :E].reshape(batch, seq, E)


def init_params(key, embed_size, forward_expansion, dtype=jnp.float32):
    """Deterministic synthetic init matching nn.Linear shapes (stored transposed)."""
    hidden = forward_expansion * embed_size
    k1, k2, k3, k4 = jax.random.split(key, 4)
    lim1 = 1.0 / (embed_size ** 0.5)
    lim2 = 1.0 / (hidden ** 0.5)
    w1 = jax.random.uniform(k1, (embed_size, hidden), dtype, -lim1, lim1)
    b1 = jax.random.uniform(k2, (hidden,), dtype, -lim1, lim1)
    w2 = jax.random.uniform(k3, (hidden, embed_size), dtype, -lim2, lim2)
    b2 = jax.random.uniform(k4, (embed_size,), dtype, -lim2, lim2)
    return w1, b1, w2, b2


if __name__ == "__main__":
    embed_size = 32
    forward_expansion = 4
    batch, seq = 2, 8

    key = jax.random.PRNGKey(0)
    kx, kp = jax.random.split(key)
    x = jax.random.normal(kx, (batch, seq, embed_size), jnp.float32)
    w1, b1, w2, b2 = init_params(kp, embed_size, forward_expansion)

    ref = jnp.maximum(x @ w1 + b1, 0.0) @ w2 + b2

    # default path: weights VMEM-resident, 1-D row grid
    out = jax.block_until_ready(feed_forward(x, w1, b1, w2, b2))
    assert out.shape == (batch, seq, embed_size)
    assert jnp.allclose(out, ref, atol=1e-5, rtol=1e-5), "mismatch vs reference"

    # ragged rows (batch*seq not a multiple of 8) -> full-dim single-tile path
    x2 = jax.random.normal(jax.random.PRNGKey(1), (2, 5, embed_size), jnp.float32)
    out2 = jax.block_until_ready(feed_forward(x2, w1, b1, w2, b2))
    ref2 = jnp.maximum(x2 @ w1 + b1, 0.0) @ w2 + b2
    assert jnp.allclose(out2, ref2, atol=1e-5, rtol=1e-5), "ragged-path mismatch"

    # force the slabbed (tiled-H, f32-accumulator) fallback used when weights
    # don't fit the VMEM budget, so that path is exercised too
    out3 = jax.block_until_ready(feed_forward(x, w1, b1, w2, b2, force_slabbed=True))
    assert jnp.allclose(out3, ref, atol=1e-5, rtol=1e-5), "slabbed-path mismatch"

    print("KERNEL_OK")
</pallas_src>

<mosaic_0001>
module attributes {stable_mosaic.version = 11 : i64} {
  func.func @_ffn_kernel_resident(%arg0: i32, %arg1: memref<8x128xf32, #tpu.memory_space<vmem>>, %arg2: memref<128x128xf32, #tpu.memory_space<vmem>>, %arg3: memref<1x128xf32, #tpu.memory_space<vmem>>, %arg4: memref<128x128xf32, #tpu.memory_space<vmem>>, %arg5: memref<1x128xf32, #tpu.memory_space<vmem>>, %arg6: memref<8x128xf32, #tpu.memory_space<vmem>>) attributes {dimension_semantics = [#tpu.dimension_semantics<parallel>], iteration_bounds = array<i64: 2>, scalar_prefetch = 0 : i64, scratch_operands = 0 : i64, tpu.core_type = #tpu.core_type<tc>, window_params = [{transform_indices = @transform_0, window_bounds = array<i64: 8, 128>}, {pipeline_mode = #tpu.pipeline_mode<synchronous>, transform_indices = @transform_1, window_bounds = array<i64: 128, 128>}, {pipeline_mode = #tpu.pipeline_mode<synchronous>, transform_indices = @transform_2, window_bounds = array<i64: 1, 128>}, {pipeline_mode = #tpu.pipeline_mode<synchronous>, transform_indices = @transform_3, window_bounds = array<i64: 128, 128>}, {pipeline_mode = #tpu.pipeline_mode<synchronous>, transform_indices = @transform_4, window_bounds = array<i64: 1, 128>}, {transform_indices = @transform_5, window_bounds = array<i64: 8, 128>}]} {
    %c0 = arith.constant 0 : index
    %c0_0 = arith.constant 0 : index
    %0 = vector.load %arg1[%c0, %c0_0] : memref<8x128xf32, #tpu.memory_space<vmem>>, vector<8x128xf32>
    %c0_1 = arith.constant 0 : index
    %c0_2 = arith.constant 0 : index
    %1 = vector.load %arg2[%c0_1, %c0_2] : memref<128x128xf32, #tpu.memory_space<vmem>>, vector<128x128xf32>
    %cst = arith.constant dense<0.000000e+00> : vector<8x128xf32>
    %2 = tpu.matmul %0, %1, %cst {dimension_numbers = #tpu.dot_dimension_numbers<[1], [0], [0], [1], [0, 0, 1, 1], [], []>} : vector<8x128xf32>, vector<128x128xf32>, vector<8x128xf32> -> vector<8x128xf32>
    %c0_3 = arith.constant 0 : index
    %c0_4 = arith.constant 0 : index
    %3 = vector.load %arg3[%c0_3, %c0_4] : memref<1x128xf32, #tpu.memory_space<vmem>>, vector<1x128xf32>
    %4 = vector.broadcast %3 : vector<1x128xf32> to vector<8x128xf32>
    %5 = arith.addf %2, %4 : vector<8x128xf32>
    %cst_5 = arith.constant 0.000000e+00 : f32
    %6 = vector.broadcast %cst_5 : f32 to vector<8x128xf32>
    %7 = arith.maximumf %5, %6 : vector<8x128xf32>
    %c0_6 = arith.constant 0 : index
    %c0_7 = arith.constant 0 : index
    %8 = vector.load %arg4[%c0_6, %c0_7] : memref<128x128xf32, #tpu.memory_space<vmem>>, vector<128x128xf32>
    %cst_8 = arith.constant dense<0.000000e+00> : vector<8x128xf32>
    %9 = tpu.matmul %7, %8, %cst_8 {dimension_numbers = #tpu.dot_dimension_numbers<[1], [0], [0], [1], [0, 0, 1, 1], [], []>} : vector<8x128xf32>, vector<128x128xf32>, vector<8x128xf32> -> vector<8x128xf32>
    %c0_9 = arith.constant 0 : index
    %c0_10 = arith.constant 0 : index
    %10 = vector.load %arg5[%c0_9, %c0_10] : memref<1x128xf32, #tpu.memory_space<vmem>>, vector<1x128xf32>
    %11 = vector.broadcast %10 : vector<1x128xf32> to vector<8x128xf32>
    %12 = arith.addf %9, %11 : vector<8x128xf32>
    %c0_11 = arith.constant 0 : index
    %c0_12 = arith.constant 0 : index
    %13 = vector.load %arg6[%c0_11, %c0_12] : memref<8x128xf32, #tpu.memory_space<vmem>>, vector<8x128xf32>
    tpu.vector_store %arg6[%c0_11, %c0_12], %12 {strides = array<i32>} : memref<8x128xf32, #tpu.memory_space<vmem>>, vector<8x128xf32>,
    return
  }
  func.func @transform_0(%arg0: i32) -> (i32, i32) {
    %c0_i32 = arith.constant 0 : i32
    %c0_i32_0 = arith.constant 0 : i32
    return %arg0, %c0_i32 : i32, i32
  }
  func.func @transform_1(%arg0: i32) -> (i32, i32) {
    %c0_i32 = arith.constant 0 : i32
    %c0_i32_0 = arith.constant 0 : i32
    %c0_i32_1 = arith.constant 0 : i32
    return %c0_i32, %c0_i32_0 : i32, i32
  }
  func.func @transform_2(%arg0: i32) -> (i32, i32) {
    %c0_i32 = arith.constant 0 : i32
    %c0_i32_0 = arith.constant 0 : i32
    %c0_i32_1 = arith.constant 0 : i32
    return %c0_i32, %c0_i32_0 : i32, i32
  }
  func.func @transform_3(%arg0: i32) -> (i32, i32) {
    %c0_i32 = arith.constant 0 : i32
    %c0_i32_0 = arith.constant 0 : i32
    %c0_i32_1 = arith.constant 0 : i32
    return %c0_i32, %c0_i32_0 : i32, i32
  }
  func.func @transform_4(%arg0: i32) -> (i32, i32) {
    %c0_i32 = arith.constant 0 : i32
    %c0_i32_0 = arith.constant 0 : i32
    %c0_i32_1 = arith.constant 0 : i32
    return %c0_i32, %c0_i32_0 : i32, i32
  }
  func.func @transform_5(%arg0: i32) -> (i32, i32) {
    %c0_i32 = arith.constant 0 : i32
    %c0_i32_0 = arith.constant 0 : i32
    return %arg0, %c0_i32 : i32, i32
  }
}

</mosaic_0001>

<bundles_post_ra>
// kernel: feed_forward.1
= control target key start
LH: loop header
LB: loop body
LE: loop exit
PB: predicated region body
PF: predicated region fallthrough
CT: control target
= control target key end

     0   :  { %s413_s18 = smov 0   ;;  %s543_s0 = inlined_call_operand.vmem [shape: f32[16,128], index: 0, kind: input, shape index: {}]   ;;  %s544_s1 = inlined_call_operand.vmem [shape: f32[128,128], index: 1, kind: input, shape index: {}]   ;;  %s545_s2 = inlined_call_operand.vmem [shape: f32[1,128], index: 2, kind: input, shape index: {}]   ;;  %s546_s3 = inlined_call_operand.vmem [shape: f32[128,128], index: 3, kind: input, shape index: {}]   ;;  %s547_s4 = inlined_call_operand.vmem [shape: f32[1,128], index: 4, kind: input, shape index: {}]   ;;  %s548_s5 = inlined_call_operand.vmem [shape: f32[16,128], index: 5, kind: output, shape index: {}]  }
   0x1 LB: > { %s356_s19 = sadd.s32 4294967295, %s381_s18   ;;  %p360_p0 = scmp.ge.s32.totalorder %s381_s18, 1  ;;  %s381_s18 = sphi %s413_s18, %s15_s18  }
   0x2   : > { %p186_p1 = scmp.lt.s32.totalorder %s381_s18, 3 }
   0x4   : > { %p187_p2 = pnand %p360_p0, %p186_p1 }
   0x5   : > { %p212_p3 = scmp.lt.s32.totalorder (!%p187_p2), %s356_s19, 1 }
   0x6   : > { %190 = sbr.rel (%p187_p2) target bundleno = 302 (0x12e), region = 40 }
   0xb   : > { %v236_v0 = vld [vmem:[%s544_s1 + $0x78] sm:$0xff]  ;;  %v235_v1 = vld [vmem:[%s544_s1 + $0x70] sm:$0xff]  ;;  %v234_v2 = vld [vmem:[%s544_s1 + $0x68] sm:$0xff]  ;;  %s550_s19 = smov (!%p212_p3, %s356_s19), 1 }
   0xc   : > { %241 = vmatpush.msra.mxu0 %v236_v0  ;;  %v233_v3 = vld [vmem:[%s544_s1 + $0x60] sm:$0xff]  ;;  %v277_v4 = vld [vmem:[%s546_s3 + $0x78] sm:$0xff]  ;;  %v276_v5 = vld [vmem:[%s546_s3 + $0x70] sm:$0xff]  ;;  %s361_s20 = sshll.u32 %s550_s19, 3 }
   0xd   : > { %v232_v6 = vld [vmem:[%s544_s1 + $0x58] sm:$0xff]  ;;  %282 = vmatpush.msra.mxu1 %v277_v4  ;;  %v275_v7 = vld [vmem:[%s546_s3 + $0x68] sm:$0xff]  ;;  %v231_v8 = vld [vmem:[%s544_s1 + $0x50] sm:$0xff]  ;;  %s215_s6 = scalar_lea.vmem %s543_s0, %s361_s20  ;;  %s219_s26 = scalar_lea.vmem %s548_s5, %s361_s20 }
   0xe   : > { %242 = vmatpush.msra.mxu0 %v235_v1  ;;  %v274_v9 = vld [vmem:[%s546_s3 + $0x60] sm:$0xff]  ;;  %v230_v10 = vld [vmem:[%s544_s1 + $0x48] sm:$0xff]  ;;  %v273_v11 = vld [vmem:[%s546_s3 + $0x58] sm:$0xff] }
   0xf   : > { %283 = vmatpush.msra.mxu1 %v276_v5  ;;  %v229_v12 = vld [vmem:[%s544_s1 + $0x40] sm:$0xff]  ;;  %v272_v13 = vld [vmem:[%s546_s3 + $0x50] sm:$0xff]  ;;  %v228_v14 = vld [vmem:[%s544_s1 + $0x38] sm:$0xff] }
  0x10   : > { %243 = vmatpush.msra.mxu0 %v234_v2  ;;  %v271_v15 = vld [vmem:[%s546_s3 + $0x48] sm:$0xff]  ;;  %v227_v16 = vld [vmem:[%s544_s1 + $0x30] sm:$0xff]  ;;  %v270_v17 = vld [vmem:[%s546_s3 + $0x40] sm:$0xff] }
  0x11   : > { %284 = vmatpush.msra.mxu1 %v275_v7  ;;  %v226_v18 = vld [vmem:[%s544_s1 + $0x28] sm:$0xff]  ;;  %v269_v19 = vld [vmem:[%s546_s3 + $0x38] sm:$0xff]  ;;  %v225_v20 = vld [vmem:[%s544_s1 + $0x20] sm:$0xff] }
  0x12   : > { %244 = vmatpush.msra.mxu0 %v233_v3  ;;  %v268_v21 = vld [vmem:[%s546_s3 + $0x30] sm:$0xff]  ;;  %v224_v22 = vld [vmem:[%s544_s1 + $0x18] sm:$0xff]  ;;  %v267_v23 = vld [vmem:[%s546_s3 + $0x28] sm:$0xff] }
  0x13   : > { %285 = vmatpush.msra.mxu1 %v274_v9  ;;  %v223_v24 = vld [vmem:[%s544_s1 + $0x10] sm:$0xff]  ;;  %v266_v25 = vld [vmem:[%s546_s3 + $0x20] sm:$0xff]  ;;  %v222_v26 = vld [vmem:[%s544_s1 + $0x8] sm:$0xff] }
  0x14   : > { %245 = vmatpush.msra.mxu0 %v232_v6  ;;  %v265_v27 = vld [vmem:[%s546_s3 + $0x18] sm:$0xff]  ;;  %v221_v28 = vld [vmem:[%s544_s1] sm:$0xff]  ;;  %v264_v30 = vld [vmem:[%s546_s3 + $0x10] sm:$0xff] }
  0x15   : > { %286 = vmatpush.msra.mxu1 %v273_v11  ;;  %v220_v29 = vld [vmem:[%s215_s6] sm:$0xff]  ;;  %v263_v31 = vld [vmem:[%s546_s3 + $0x8] sm:$0xff] }
  0x16   : > { %246 = vmatpush.msra.mxu0 %v231_v8  ;;  %v262_v32 = vld [vmem:[%s546_s3] sm:$0xff] }
  0x17   : > { %287 = vmatpush.msra.mxu1 %v272_v13  ;;  %v373_v33 = vld [vmem:[%s545_s2] ss:$0 sm:$0xff] }
  0x18   : > { %247 = vmatpush.msra.mxu0 %v230_v10  ;;  %v374_v37 = vld [vmem:[%s547_s4] ss:$0 sm:$0xff] }
  0x19   : > { %288 = vmatpush.msra.mxu1 %v271_v15 }
  0x1a   : > { %248 = vmatpush.msra.mxu0 %v229_v12 }
  0x1b   : > { %289 = vmatpush.msra.mxu1 %v270_v17 }
  0x1c   : > { %249 = vmatpush.msra.mxu0 %v228_v14 }
  0x1d   : > { %290 = vmatpush.msra.mxu1 %v269_v19 }
  0x1e   : > { %250 = vmatpush.msra.mxu0 %v227_v16 }
  0x1f   : > { %291 = vmatpush.msra.mxu1 %v268_v21 }
  0x20   : > { %251 = vmatpush.msra.mxu0 %v226_v18 }
  0x21   : > { %292 = vmatpush.msra.mxu1 %v267_v23 }
  0x22   : > { %252 = vmatpush.msra.mxu0 %v225_v20 }
  0x23   : > { %293 = vmatpush.msra.mxu1 %v266_v25 }
  0x24   : > { %253 = vmatpush.msra.mxu0 %v224_v22 }
  0x25   : > { %294 = vmatpush.msra.mxu1 %v265_v27 }
  0x26   : > { %254 = vmatpush.msra.mxu0 %v223_v24 }
  0x27   : > { %295 = vmatpush.msra.mxu1 %v264_v30 }
  0x28   : > { %255 = vmatpush.msra.mxu0 %v222_v26 }
  0x29   : > { %296 = vmatpush.msra.mxu1 %v263_v31 }
  0x2a   : > { %256 = vmatpush.msra.mxu0 %v221_v28 }
  0x2b   : > { %257 = vmatmul.f32.vlgmr.msra.gmra.mxu0 %v220_v29  ;;  %297 = vmatpush.msra.mxu1 %v262_v32 }
  0xa8   : > { %v258_v34 = vpop.f32.mrf.mxu0 }
  0xa9   : > { %v259_v35 = vadd.f32 %v373_v33, %v258_v34 }
  0xab   : > { %v261_v36 = vmax.f32 %v259_v35, 0.0 }
  0xad   : > { %298 = vmatmul.f32.vlgmr.msra.gmra.mxu1 %v261_v36 }
 0x12a   : > { %v299_v38 = vpop.f32.mrf.mxu1 }
 0x12b   : > { %v300_v39 = vadd.f32 %v374_v37, %v299_v38 }
 0x12d   : > { %302 = vst [vmem:[%s219_s26] sm:$0xff] %v300_v39 }
 0x12e PF: > { %s15_s18 = sadd.s32 1, %s381_s18  }
 0x12f   : > { %p12_p4 = scmp.ge.s32.totalorder %s15_s18, 4  }
 0x131   :  { %14 = sbr.rel (!%p12_p4) target bundleno = 1 (0x1), region = 70 }

</bundles_post_ra>
